<compile_context>
chip_gen: v7x
topology: tpu7x:2x2x1
jax: 0.10.0
libtpu: 0.0.40
codegen_flags: <defaults>
</compile_context>

<pallas_src>
import functools

import jax
import jax.numpy as jnp
from jax.experimental import pallas as pl
from jax.experimental.pallas import tpu as pltpu


def _round_up(v, m):
    return (v + m - 1) // m * m


def resblock_kernel(x_ref, w1_ref, b1_ref, w2_ref, b2_ref, o_ref, *,
                    H, W, use_bf16_dots):
    # x_ref : (Cp, B*H*W)  padded-channel input, lane axis = flat(b, y, x)
    # w1_ref: (Cmp, 9*Cp)  3x3 conv weights, K ordered as (tap(dy,dx), cin)
    # b1_ref: (Cmp, 1)
    # w2_ref: (Cp, Cmp)    1x1 conv weights (output channels padded)
    # b2_ref: (Cp, 1)
    # o_ref : (Cp, B*H*W)
    Cp, BHW = x_ref.shape

    x = x_ref[...]                         # residual stream (pre-ReLU)
    xr = jnp.maximum(x, 0.0)               # first ReLU

    # Per-pixel (row, col) within each image from the flat lane index.
    lane = jax.lax.broadcasted_iota(jnp.int32, (Cp, BHW), 1)
    if (W & (W - 1)) == 0:                 # power-of-two fast path
        col = lane & (W - 1)
        rowq = lane >> (W.bit_length() - 1)
    else:
        col = lane % W
        rowq = lane // W
    if (H & (H - 1)) == 0:
        row = rowq & (H - 1)
    else:
        row = rowq % H

    mask_l = col >= 1          # source column x-1 in-bounds
    mask_r = col <= W - 2      # source column x+1 in-bounds
    mask_t = row >= 1          # source row    y-1 in-bounds
    mask_b = row <= H - 2      # source row    y+1 in-bounds

    # im2col via XLU lane rotations + boundary masks.  The circular wrap of
    # each roll (within and across images) only touches pixels whose tap is
    # out-of-bounds, and those are exactly the masked ones.
    taps = []
    for dy in range(3):
        for dx in range(3):
            off = (dy - 1) * W + (dx - 1)
            if off == 0:
                t = xr
            else:
                t = pltpu.roll(xr, shift=(-off) % BHW, axis=1)
            m = None
            if dy == 0:
                m = mask_t
            elif dy == 2:
                m = mask_b
            if dx == 0:
                m = mask_l if m is None else jnp.logical_and(m, mask_l)
            elif dx == 2:
                m = mask_r if m is None else jnp.logical_and(m, mask_r)
            if m is not None:
                t = jnp.where(m, t, 0.0)
            taps.append(t)
    patches = jnp.concatenate(taps, axis=0)          # (9*Cp, BHW), tile-aligned

    w1 = w1_ref[...]
    w2 = w2_ref[...]
    if use_bf16_dots:                                 # optional, off by default
        patches = patches.astype(jnp.bfloat16)
        w1 = w1.astype(jnp.bfloat16)
        w2 = w2.astype(jnp.bfloat16)

    # Conv3x3 as one fused MXU matmul, bias + ReLU, then Conv1x1.
    h = jnp.dot(w1, patches, preferred_element_type=jnp.float32)   # (Cmp, BHW)
    h = jnp.maximum(h + b1_ref[...], 0.0)                          # second ReLU
    if use_bf16_dots:
        h = h.astype(jnp.bfloat16)
    out = jnp.dot(w2, h, preferred_element_type=jnp.float32)       # (Cp, BHW)

    # bias + residual add, unmasked full-tile lane-dense store.
    o_ref[...] = out + b2_ref[...] + x


def _default_grid_steps(N, HW):
    """1 step on single-TensorCore parts (v5e/v6e); 2 parallel steps on v7x."""
    try:
        kind = jax.devices()[0].device_kind.lower()
    except Exception:
        kind = ""
    two_tc = ("v7" in kind) or ("7x" in kind)
    if two_tc and N % 2 == 0 and ((N // 2) * HW) % 128 == 0:
        return 2
    return 1


def resblock_forward(x_nchw, w1, b1, w2, b2, *, num_grid_steps=None,
                     use_bf16_dots=False):
    """x_nchw: (N, Cin, H, W) f32; w1: (Cmid, Cin, 3, 3); b1: (Cmid,);
    w2: (Cin, Cmid, 1, 1); b2: (Cin,)."""
    N, Cin, H, W = x_nchw.shape
    Cmid = w1.shape[0]
    HW = H * W
    Cp = _round_up(Cin, 8)        # 8-sublane f32 granule
    Cmp = _round_up(Cmid, 8)

    steps = (_default_grid_steps(N, HW) if num_grid_steps is None
             else num_grid_steps)
    assert N % steps == 0, "batch must divide the number of grid steps"
    lane_block = (N // steps) * HW

    # Layout plumbing (tiny, wrapper-side): channel-major lane-folded input,
    # channels zero-padded to the sublane granule; weights reordered so K is
    # (tap, cin_padded).
    x_cm = jnp.transpose(x_nchw, (1, 0, 2, 3)).reshape(Cin, N * HW)
    x_cm = jnp.pad(x_cm, ((0, Cp - Cin), (0, 0)))

    w1p = jnp.pad(w1, ((0, Cmp - Cmid), (0, Cp - Cin), (0, 0), (0, 0)))
    w1f = jnp.transpose(w1p, (0, 2, 3, 1)).reshape(Cmp, 9 * Cp)
    w2f = jnp.pad(w2[:, :, 0, 0], ((0, Cp - Cin), (0, Cmp - Cmid)))
    b1c = jnp.pad(b1, (0, Cmp - Cmid)).reshape(Cmp, 1)
    b2c = jnp.pad(b2, (0, Cp - Cin)).reshape(Cp, 1)

    kernel = functools.partial(resblock_kernel, H=H, W=W,
                               use_bf16_dots=use_bf16_dots)

    out_cm = pl.pallas_call(
        kernel,
        out_shape=jax.ShapeDtypeStruct((Cp, N * HW), jnp.float32),
        grid=(steps,),
        in_specs=[
            pl.BlockSpec((Cp, lane_block), lambda i: (0, i)),
            pl.BlockSpec((Cmp, 9 * Cp), lambda i: (0, 0)),
            pl.BlockSpec((Cmp, 1), lambda i: (0, 0)),
            pl.BlockSpec((Cp, Cmp), lambda i: (0, 0)),
            pl.BlockSpec((Cp, 1), lambda i: (0, 0)),
        ],
        out_specs=pl.BlockSpec((Cp, lane_block), lambda i: (0, i)),
        compiler_params=pltpu.CompilerParams(
            dimension_semantics=("parallel",)),
    )(x_cm, w1f, b1c, w2f, b2c)

    # Drop pad channels, restore NCHW.
    return out_cm[:Cin].reshape(Cin, N, H, W).transpose(1, 0, 2, 3)


def resblock_ref(x, w1, b1, w2, b2):
    """Pure-JAX reference (NCHW), semantically identical to the torch module."""
    h = jax.nn.relu(x)
    h = jax.lax.conv_general_dilated(
        h, w1, (1, 1), ((1, 1), (1, 1)),
        dimension_numbers=("NCHW", "OIHW", "NCHW"))
    h = h + b1.reshape(1, -1, 1, 1)
    h = jax.nn.relu(h)
    h = jax.lax.conv_general_dilated(
        h, w2, (1, 1), ((0, 0), (0, 0)),
        dimension_numbers=("NCHW", "OIHW", "NCHW"))
    h = h + b2.reshape(1, -1, 1, 1)
    return h + x


if __name__ == "__main__":
    # Small shapes consistent with the module: N=2, in_channel=4, channel=8, 16x16.
    N, Cin, Cmid, H, W = 2, 4, 8, 16, 16

    key = jax.random.PRNGKey(0)
    k1, k2, k3, k4, k5 = jax.random.split(key, 5)
    x = jax.random.normal(k1, (N, Cin, H, W), jnp.float32)
    # Deterministic synthetic parameters (shapes match nn.Conv2d in __init__).
    w1 = jax.random.normal(k2, (Cmid, Cin, 3, 3), jnp.float32) * 0.1
    b1 = jax.random.normal(k3, (Cmid,), jnp.float32) * 0.1
    w2 = jax.random.normal(k4, (Cin, Cmid, 1, 1), jnp.float32) * 0.1
    b2 = jax.random.normal(k5, (Cin,), jnp.float32) * 0.1

    out = resblock_forward(x, w1, b1, w2, b2)
    jax.block_until_ready(out)

    ref = resblock_ref(x, w1, b1, w2, b2)
    assert out.shape == ref.shape == (N, Cin, H, W)
    assert jnp.allclose(out, ref, atol=1e-3, rtol=1e-3)

    print("KERNEL_OK")
</pallas_src>

<mosaic_0001>
module attributes {stable_mosaic.version = 11 : i64} {
  func.func @resblock_kernel(%arg0: i32, %arg1: memref<8x512xf32, #tpu.memory_space<vmem>>, %arg2: memref<8x72xf32, #tpu.memory_space<vmem>>, %arg3: memref<8x1xf32, #tpu.memory_space<vmem>>, %arg4: memref<8x8xf32, #tpu.memory_space<vmem>>, %arg5: memref<8x1xf32, #tpu.memory_space<vmem>>, %arg6: memref<8x512xf32, #tpu.memory_space<vmem>>) attributes {dimension_semantics = [#tpu.dimension_semantics<parallel>], iteration_bounds = array<i64: 1>, scalar_prefetch = 0 : i64, scratch_operands = 0 : i64, tpu.core_type = #tpu.core_type<tc>, window_params = [{transform_indices = @transform_0, window_bounds = array<i64: 8, 512>}, {pipeline_mode = #tpu.pipeline_mode<synchronous>, transform_indices = @transform_1, window_bounds = array<i64: 8, 72>}, {pipeline_mode = #tpu.pipeline_mode<synchronous>, transform_indices = @transform_2, window_bounds = array<i64: 8, 1>}, {pipeline_mode = #tpu.pipeline_mode<synchronous>, transform_indices = @transform_3, window_bounds = array<i64: 8, 8>}, {pipeline_mode = #tpu.pipeline_mode<synchronous>, transform_indices = @transform_4, window_bounds = array<i64: 8, 1>}, {transform_indices = @transform_5, window_bounds = array<i64: 8, 512>}]} {
    %c0 = arith.constant 0 : index
    %c0_0 = arith.constant 0 : index
    %0 = vector.load %arg1[%c0, %c0_0] : memref<8x512xf32, #tpu.memory_space<vmem>>, vector<8x512xf32>
    %cst = arith.constant 0.000000e+00 : f32
    %1 = vector.broadcast %cst : f32 to vector<8x512xf32>
    %2 = arith.maximumf %0, %1 : vector<8x512xf32>
    %3 = tpu.iota {dimensions = array<i32: 1>} : vector<8x512xi32>
    %c15_i32 = arith.constant 15 : i32
    %4 = vector.broadcast %c15_i32 : i32 to vector<8x512xi32>
    %5 = arith.andi %3, %4 : vector<8x512xi32>
    %c4_i32 = arith.constant 4 : i32
    %6 = vector.broadcast %c4_i32 : i32 to vector<8x512xi32>
    %7 = arith.shrsi %3, %6 : vector<8x512xi32>
    %c15_i32_1 = arith.constant 15 : i32
    %8 = vector.broadcast %c15_i32_1 : i32 to vector<8x512xi32>
    %9 = arith.andi %7, %8 : vector<8x512xi32>
    %c1_i32 = arith.constant 1 : i32
    %10 = vector.broadcast %c1_i32 : i32 to vector<8x512xi32>
    %11 = arith.cmpi sge, %5, %10 : vector<8x512xi32>
    %c14_i32 = arith.constant 14 : i32
    %12 = vector.broadcast %c14_i32 : i32 to vector<8x512xi32>
    %13 = arith.cmpi sle, %5, %12 : vector<8x512xi32>
    %c1_i32_2 = arith.constant 1 : i32
    %14 = vector.broadcast %c1_i32_2 : i32 to vector<8x512xi32>
    %15 = arith.cmpi sge, %9, %14 : vector<8x512xi32>
    %c14_i32_3 = arith.constant 14 : i32
    %16 = vector.broadcast %c14_i32_3 : i32 to vector<8x512xi32>
    %17 = arith.cmpi sle, %9, %16 : vector<8x512xi32>
    %c17_i32 = arith.constant 17 : i32
    %18 = tpu.dynamic_rotate %2 by %c17_i32 dim 1 : vector<8x512xf32>, i32 -> vector<8x512xf32>
    %19 = arith.andi %15, %11 : vector<8x512xi1>
    %cst_4 = arith.constant 0.000000e+00 : f32
    %20 = vector.broadcast %cst_4 : f32 to vector<8x512xf32>
    %21 = arith.select %19, %18, %20 : vector<8x512xi1>, vector<8x512xf32>
    %c16_i32 = arith.constant 16 : i32
    %22 = tpu.dynamic_rotate %2 by %c16_i32 dim 1 : vector<8x512xf32>, i32 -> vector<8x512xf32>
    %cst_5 = arith.constant 0.000000e+00 : f32
    %23 = vector.broadcast %cst_5 : f32 to vector<8x512xf32>
    %24 = arith.select %15, %22, %23 : vector<8x512xi1>, vector<8x512xf32>
    %c15_i32_6 = arith.constant 15 : i32
    %25 = tpu.dynamic_rotate %2 by %c15_i32_6 dim 1 : vector<8x512xf32>, i32 -> vector<8x512xf32>
    %26 = arith.andi %15, %13 : vector<8x512xi1>
    %cst_7 = arith.constant 0.000000e+00 : f32
    %27 = vector.broadcast %cst_7 : f32 to vector<8x512xf32>
    %28 = arith.select %26, %25, %27 : vector<8x512xi1>, vector<8x512xf32>
    %c1_i32_8 = arith.constant 1 : i32
    %29 = tpu.dynamic_rotate %2 by %c1_i32_8 dim 1 : vector<8x512xf32>, i32 -> vector<8x512xf32>
    %cst_9 = arith.constant 0.000000e+00 : f32
    %30 = vector.broadcast %cst_9 : f32 to vector<8x512xf32>
    %31 = arith.select %11, %29, %30 : vector<8x512xi1>, vector<8x512xf32>
    %c511_i32 = arith.constant 511 : i32
    %32 = tpu.dynamic_rotate %2 by %c511_i32 dim 1 : vector<8x512xf32>, i32 -> vector<8x512xf32>
    %cst_10 = arith.constant 0.000000e+00 : f32
    %33 = vector.broadcast %cst_10 : f32 to vector<8x512xf32>
    %34 = arith.select %13, %32, %33 : vector<8x512xi1>, vector<8x512xf32>
    %c497_i32 = arith.constant 497 : i32
    %35 = tpu.dynamic_rotate %2 by %c497_i32 dim 1 : vector<8x512xf32>, i32 -> vector<8x512xf32>
    %36 = arith.andi %17, %11 : vector<8x512xi1>
    %cst_11 = arith.constant 0.000000e+00 : f32
    %37 = vector.broadcast %cst_11 : f32 to vector<8x512xf32>
    %38 = arith.select %36, %35, %37 : vector<8x512xi1>, vector<8x512xf32>
    %c496_i32 = arith.constant 496 : i32
    %39 = tpu.dynamic_rotate %2 by %c496_i32 dim 1 : vector<8x512xf32>, i32 -> vector<8x512xf32>
    %cst_12 = arith.constant 0.000000e+00 : f32
    %40 = vector.broadcast %cst_12 : f32 to vector<8x512xf32>
    %41 = arith.select %17, %39, %40 : vector<8x512xi1>, vector<8x512xf32>
    %c495_i32 = arith.constant 495 : i32
    %42 = tpu.dynamic_rotate %2 by %c495_i32 dim 1 : vector<8x512xf32>, i32 -> vector<8x512xf32>
    %43 = arith.andi %17, %13 : vector<8x512xi1>
    %cst_13 = arith.constant 0.000000e+00 : f32
    %44 = vector.broadcast %cst_13 : f32 to vector<8x512xf32>
    %45 = arith.select %43, %42, %44 : vector<8x512xi1>, vector<8x512xf32>
    %46 = tpu.concatenate %21, %24, %28, %31, %2, %34, %38, %41, %45 in 0 : vector<8x512xf32>, vector<8x512xf32>, vector<8x512xf32>, vector<8x512xf32>, vector<8x512xf32>, vector<8x512xf32>, vector<8x512xf32>, vector<8x512xf32>, vector<8x512xf32> -> vector<72x512xf32>
    %c0_14 = arith.constant 0 : index
    %c0_15 = arith.constant 0 : index
    %47 = vector.load %arg2[%c0_14, %c0_15] : memref<8x72xf32, #tpu.memory_space<vmem>>, vector<8x72xf32>
    %c0_16 = arith.constant 0 : index
    %c0_17 = arith.constant 0 : index
    %48 = vector.load %arg4[%c0_16, %c0_17] : memref<8x8xf32, #tpu.memory_space<vmem>>, vector<8x8xf32>
    %cst_18 = arith.constant dense<0.000000e+00> : vector<8x512xf32>
    %49 = tpu.matmul %47, %46, %cst_18 {dimension_numbers = #tpu.dot_dimension_numbers<[1], [0], [0], [1], [0, 0, 1, 1], [], []>} : vector<8x72xf32>, vector<72x512xf32>, vector<8x512xf32> -> vector<8x512xf32>
    %c0_19 = arith.constant 0 : index
    %c0_20 = arith.constant 0 : index
    %50 = vector.load %arg3[%c0_19, %c0_20] : memref<8x1xf32, #tpu.memory_space<vmem>>, vector<8x1xf32>
    %51 = vector.broadcast %50 : vector<8x1xf32> to vector<8x512xf32>
    %52 = arith.addf %49, %51 : vector<8x512xf32>
    %cst_21 = arith.constant 0.000000e+00 : f32
    %53 = vector.broadcast %cst_21 : f32 to vector<8x512xf32>
    %54 = arith.maximumf %52, %53 : vector<8x512xf32>
    %cst_22 = arith.constant dense<0.000000e+00> : vector<8x512xf32>
    %55 = tpu.matmul %48, %54, %cst_22 {dimension_numbers = #tpu.dot_dimension_numbers<[1], [0], [0], [1], [0, 0, 1, 1], [], []>} : vector<8x8xf32>, vector<8x512xf32>, vector<8x512xf32> -> vector<8x512xf32>
    %c0_23 = arith.constant 0 : index
    %c0_24 = arith.constant 0 : index
    %56 = vector.load %arg5[%c0_23, %c0_24] : memref<8x1xf32, #tpu.memory_space<vmem>>, vector<8x1xf32>
    %57 = vector.broadcast %56 : vector<8x1xf32> to vector<8x512xf32>
    %58 = arith.addf %55, %57 : vector<8x512xf32>
    %59 = arith.addf %58, %0 : vector<8x512xf32>
    %c0_25 = arith.constant 0 : index
    %c0_26 = arith.constant 0 : index
    %60 = vector.load %arg6[%c0_25, %c0_26] : memref<8x512xf32, #tpu.memory_space<vmem>>, vector<8x512xf32>
    tpu.vector_store %arg6[%c0_25, %c0_26], %59 {strides = array<i32>} : memref<8x512xf32, #tpu.memory_space<vmem>>, vector<8x512xf32>,
    return
  }
  func.func @transform_0(%arg0: i32) -> (i32, i32) {
    %c0_i32 = arith.constant 0 : i32
    %c0_i32_0 = arith.constant 0 : i32
    return %c0_i32, %arg0 : i32, i32
  }
  func.func @transform_1(%arg0: i32) -> (i32, i32) {
    %c0_i32 = arith.constant 0 : i32
    %c0_i32_0 = arith.constant 0 : i32
    %c0_i32_1 = arith.constant 0 : i32
    return %c0_i32, %c0_i32_0 : i32, i32
  }
  func.func @transform_2(%arg0: i32) -> (i32, i32) {
    %c0_i32 = arith.constant 0 : i32
    %c0_i32_0 = arith.constant 0 : i32
    %c0_i32_1 = arith.constant 0 : i32
    return %c0_i32, %c0_i32_0 : i32, i32
  }
  func.func @transform_3(%arg0: i32) -> (i32, i32) {
    %c0_i32 = arith.constant 0 : i32
    %c0_i32_0 = arith.constant 0 : i32
    %c0_i32_1 = arith.constant 0 : i32
    return %c0_i32, %c0_i32_0 : i32, i32
  }
  func.func @transform_4(%arg0: i32) -> (i32, i32) {
    %c0_i32 = arith.constant 0 : i32
    %c0_i32_0 = arith.constant 0 : i32
    %c0_i32_1 = arith.constant 0 : i32
    return %c0_i32, %c0_i32_0 : i32, i32
  }
  func.func @transform_5(%arg0: i32) -> (i32, i32) {
    %c0_i32 = arith.constant 0 : i32
    %c0_i32_0 = arith.constant 0 : i32
    return %c0_i32, %arg0 : i32, i32
  }
}

</mosaic_0001>

<bundles_post_ra>
// kernel: tpu_custom_call.1
= control target key start
LH: loop header
LB: loop body
LE: loop exit
PB: predicated region body
PF: predicated region fallthrough
CT: control target
= control target key end

     0   :  { %10 = vsyncpa [#allocation3], 0  ;;  %s1224_s0 = inlined_call_operand.hbm [shape: f32[8,512], index: 0, kind: input, shape index: {}]   ;;  %s1225_s1 = inlined_call_operand.vmem [shape: f32[8,72], index: 1, kind: input, shape index: {}]   ;;  %s1226_s2 = inlined_call_operand.vmem [shape: f32[8,1], index: 2, kind: input, shape index: {}]   ;;  %s1227_s3 = inlined_call_operand.vmem [shape: f32[8,8], index: 3, kind: input, shape index: {}]   ;;  %s1228_s4 = inlined_call_operand.vmem [shape: f32[8,1], index: 4, kind: input, shape index: {}]   ;;  %s1229_s5 = inlined_call_operand.hbm [shape: f32[8,512], index: 5, kind: output, shape index: {}]  }
   0x1   :  { %11 = vsyncpa [#allocation4], 0  ;;  %s776_s18 = smov [#allocation2]   ;;  %s728_s22 = scalar_lea.hbm %s1224_s0, 512 }
   0x2   :  { %s18_s19 = sshll.u32 %s776_s18, 4  ;;  %p729_p0 = scmp.ne.s32.totalorder %s1224_s0, %s728_s22  ;;  %s19_s19 = int_to_ptr.vmem [resolvable:$true] %s18_s19 }
   0x3   :  { %p732_p1 = scmp.lt.u32.totalorder %s728_s22, %s1224_s0 }
   0x5   :  { %p734_p2 = pnand %p732_p1, %p729_p0 }
   0x7   :  { %737 = shalt.err (!%p734_p2)
}
   0x8   :  { %s738_s27 = scalar_lea.vmem %s19_s19, 512  ;;  %p743_p4 = scmp.lt.s32.totalorder %s19_s19, %s19_s19 }
   0x9   :  { %p739_p3 = scmp.ne.s32.totalorder %s19_s19, %s738_s27  ;;  %p744_p5 = scmp.lt.s32.totalorder %s738_s27, %s738_s27 }
   0xb   :  { %p745_p6 = por %p744_p5, %p743_p4 }
   0xd   :  { %p746_p7 = pnand %p745_p6, %p739_p3 }
   0xf   :  { %749 = shalt.err (!%p746_p7)
}
  0x10   :  { %21 = dma.hbm_to_vmem [thread:$0]  %s1224_s0, 512, %s19_s19, [#allocation3]  }
  0x11   :  { %772 = dma.done.wait [#allocation3], 512  }
  0x12   :  { %773 = vsyncadd [#allocation3], 4294966784  ;;  %v831_v0 = vld [vmem:[#allocation2] sm:$0xff]  ;;  %v833_v1 = vld [vmem:[#allocation2 + $0x8] sm:$0xff]  ;;  %s777_s0 = smov 16   ;;  %s778_s30 = smov 17   ;;  %v41_v13 = vlaneseq }
  0x13   :  { %v835_v2 = vld [vmem:[#allocation2 + $0x10] sm:$0xff]  ;;  %v838_v3 = vmax.f32 %v831_v0, 0.0  ;;  %v841_v4 = vmax.f32 %v833_v1, 0.0  ;;  %v843_v5 = vld [vmem:[#allocation2 + $0x18] sm:$0xff]  ;;  %s779_s6 = smov 15   ;;  %s780_s7 = smov 1  }
  0x14   :  { %v846_v6 = vmax.f32 %v835_v2, 0.0  ;;  %v849_v7 = vmax.f32 %v843_v5, 0.0  ;;  %s781_s8 = smov 127   ;;  %s782_s9 = smov 113   ;;  %v783_v10 = vmov 0.0   ;;  %v784_v11 = vmov 0  }
  0x15   :  { %v666_v8 = vpack.i.bf16 %v841_v4, %v838_v3  ;;  %302 = vmatprep.mubr.f32.mxu0 %v783_v10  ;;  %373 = vmatprep.mubr.f32.mxu1 %v783_v10  ;;  %s785_s10 = smov 112   ;;  %s786_s11 = smov 111   ;;  %v228_v12 = vld [vmem:[%s1226_s2] sm:$0xff]  ;;  %v864_v14 = vand.u32 127, %v41_v13  ;;  %v1252_v47 = vmov 0  ;;  %v1256_v53 = vmov 0 }
  0x16   :  { %v671_v9 = vpack.i.bf16 %v849_v7, %v846_v6  ;;  %726 = vset.pattern.permute.xlu0 %v784_v11  ;;  %727 = vset.pattern.permute.xlu1 %v784_v11  ;;  %v1260_v11 = vmov 0 }
  0x17   :  { %667 = vrot.lane.b32.xlu1 %v666_v8, %s777_s0  ;;  %657 = vrot.lane.b32.xlu0 %v666_v8, %s778_s30  ;;  %v43_v15 = vadd.s32 128, %v864_v14  ;;  %v45_v16 = vadd.s32 384, %v864_v14  ;;  %v50_v18 = vshra.s32 %v864_v14, 4  ;;  %v44_v20 = vadd.s32 256, %v864_v14 }
  0x18   :  { %v46_v23 = vand.u32 15, %v864_v14  ;;  %vm82_vm6 = vcmp.lt.s32.totalorder %v864_v14, 17  ;;  %vm103_vm8 = vcmp.lt.s32.totalorder %v864_v14, 16 }
  0x19   :  { %v51_v17 = vshra.s32 %v43_v15, 4  ;;  %v53_v19 = vshra.s32 %v45_v16, 4  ;;  %v47_v21 = vand.u32 15, %v43_v15  ;;  %v873_v24 = vand.u32 15, %v50_v18 }
  0x1a   :  { %v49_v25 = vand.u32 15, %v45_v16  ;;  %v52_v27 = vshra.s32 %v44_v20, 4  ;;  %vm882_vm2 = vcmp.ge.s32.totalorder %v46_v23, 1  ;;  %v48_v31 = vand.u32 15, %v44_v20 }
  0x1b   :  { %672 = vrot.lane.b32.xlu1 %v671_v9, %s777_s0  ;;  %662 = vrot.lane.b32.xlu0 %v671_v9, %s778_s30  ;;  %v870_v22 = vand.u32 15, %v51_v17  ;;  %v875_v26 = vand.u32 15, %v53_v19  ;;  %vm877_vm0 = vcmp.ge.s32.totalorder %v47_v21, 1  ;;  %vm1230_vm3 = vcmp.ge.s32.totalorder %v873_v24, 1 }
  0x1c   :  { %vm887_vm4 = vcmp.ge.s32.totalorder %v49_v25, 1  ;;  %v892_v32 = vand.u32 15, %v52_v27  ;;  %vm87_vm9 = vmand %vm1230_vm3, %vm882_vm2  ;;  %vm918_vm12 = vcmp.ge.s32.totalorder %v48_v31, 1  ;;  %vm929_vm15 = vcmp.le.s32.totalorder %v47_v21, 14 }
  0x1d   :  { %vm67_vm1 = vcmp.ge.s32.totalorder %v870_v22, 1  ;;  %vm1231_vm5 = vcmp.ge.s32.totalorder %v875_v26, 1  ;;  %vm925_vm14 = vmpackc.low %vm1230_vm3, %vm87_vm9  ;;  %v1253_v47 = vsel %vm929_vm15, 4294967295, %v1252_v47  ;;  %vm945_vm3 = vcmp.le.s32.totalorder %v49_v25, 14 }
  0x1e   :  { %vm88_vm7 = vmand %vm67_vm1, %vm877_vm0  ;;  %vm1232_vm13 = vcmp.ge.s32.totalorder %v892_v32, 1  ;;  %v1257_v53 = vsel %vm945_vm3, 4294967295, %v1256_v53 }
  0x1f   :  { %682 = vrot.lane.b32.xlu1 %v671_v9, %s779_s6  ;;  %677 = vrot.lane.b32.xlu0 %v666_v8, %s779_s6  ;;  %vm908_vm10 = vmand %vm1231_vm5, %vm887_vm4 }
  0x20   :  { %vm596_vm11 = vmpackc.low %vm67_vm1, %vm88_vm7 }
  0x21   :  { %vm937_vm7 = vmpackc.low %vm1231_vm5, %vm908_vm10  ;;  %vm971_vm5 = vcmp.le.s32.totalorder %v46_v23, 14 }
  0x22   :  { %vm89_vm9 = vmand %vm1232_vm13, %vm918_vm12  ;;  %v1261_v11 = vsel %vm971_vm5, 4294967295, %v1260_v11 }
  0x23   :  { %692 = vrot.lane.b32.xlu1 %v671_v9, %s780_s7  ;;  %687 = vrot.lane.b32.xlu0 %v666_v8, %s780_s7  ;;  %vm961_vm10 = vmand %vm67_vm1, %vm929_vm15  ;;  %vm975_vm1 = vcmp.le.s32.totalorder %v48_v31, 14 }
  0x27   :  { %702 = vrot.lane.b32.xlu1 %v671_v9, %s781_s8  ;;  %697 = vrot.lane.b32.xlu0 %v666_v8, %s781_s8 }
  0x2b   :  { %712 = vrot.lane.b32.xlu1 %v671_v9, %s782_s9  ;;  %707 = vrot.lane.b32.xlu0 %v666_v8, %s782_s9 }
  0x2f   :  { %722 = vrot.lane.b32.xlu1 %v671_v9, %s785_s10  ;;  %717 = vrot.lane.b32.xlu0 %v666_v8, %s785_s10 }
  0x33   :  { %207 = vrot.lane.b32.xlu1 %v841_v4, %s786_s11  ;;  %205 = vrot.lane.b32.xlu0 %v838_v3, %s786_s11 }
  0x37   :  { %211 = vrot.lane.b32.xlu1 %v849_v7, %s786_s11  ;;  %209 = vrot.lane.b32.xlu0 %v846_v6, %s786_s11 }
  0x3b   :  { %231 = vperm.xlu0 %726, %v228_v12   ;;  %v1262_v12 = vmov 0 }
  0x3c   :  { %v1263_v12 = vsel %vm975_vm1, 4294967295, %v1262_v12 }
  0x89   :  { %v668_v33 = vpop.permute.xlu1 %667  ;;  %v658_v34 = vpop.permute.xlu0 %657 }
  0x8a   :  { %v670_v35 = vunpack.i.h.bf16 %v668_v33  ;;  %v669_v36 = vunpack.i.l.bf16 %v668_v33  ;;  %v660_v37 = vunpack.i.h.bf16 %v658_v34  ;;  %v659_v38 = vunpack.i.l.bf16 %v658_v34 }
  0x8c   :  { %v85_v40 = vsel %vm82_vm6, %v659_v38, %v660_v37  ;;  %v106_v41 = vsel %vm103_vm8, %v669_v36, %v670_v35 }
  0x8d   :  { %v673_v43 = vpop.permute.xlu1 %672  ;;  %v663_v44 = vpop.permute.xlu0 %662  ;;  %v595_v45 = vpack.c.bf16 %v106_v41, %v85_v40 }
  0x8e   :  { %v675_v48 = vunpack.i.h.bf16 %v673_v43  ;;  %v674_v49 = vunpack.i.l.bf16 %v673_v43  ;;  %v665_v50 = vunpack.i.h.bf16 %v663_v44  ;;  %v664_v51 = vunpack.i.l.bf16 %v663_v44 }
  0x8f   :  { %597 = vmatprep.subr.msk.bf16.mxu0 %vm596_vm11, %v595_v45  ;;  %vm623_vm11 = vmpackc.low %vm1232_vm13, %vm89_vm9  ;;  %vm1264_vm9 = vcmp.ge.s32.totalorder %v875_v26, 1 }
  0x90   :  { %v86_v54 = vsel %vm82_vm6, %v665_v50, %v659_v38  ;;  %v107_v55 = vsel %vm103_vm8, %v675_v48, %v669_v36  ;;  %v83_v56 = vsel %vm82_vm6, %v664_v51, %v665_v50  ;;  %v104_v57 = vsel %vm103_vm8, %v674_v49, %v675_v48  ;;  %vm992_vm13 = vmand %vm1264_vm9, %vm945_vm3 }
  0x91   :  { %v683_v59 = vpop.permute.xlu1 %682  ;;  %v678_v60 = vpop.permute.xlu0 %677  ;;  %v598_v61 = vpack.c.bf16 %v107_v55, %v86_v54  ;;  %v619_v62 = vpack.c.bf16 %v104_v57, %v83_v56  ;;  %v84_v63 = vsel %vm82_vm6, %v660_v37, %v664_v51  ;;  %v105_v8 = vsel %vm103_vm8, %v670_v35, %v674_v49 }
  0x92   :  { %v685_v9 = vunpack.i.h.bf16 %v683_v59  ;;  %v684_v13 = vunpack.i.l.bf16 %v683_v59  ;;  %v680_v15 = vunpack.i.h.bf16 %v678_v60  ;;  %v679_v16 = vunpack.i.l.bf16 %v678_v60 }
  0x93   :  { %600 = vmatpush1.bf16.msk.msra.mxu0 %vm925_vm14, %v598_v61  ;;  %621 = vmatprep.subr.msk.bf16.mxu1 %vm937_vm7, %v619_v62  ;;  %v622_v17 = vpack.c.bf16 %v105_v8, %v84_v63  ;;  %vm1267_vm6 = vcmp.ge.s32.totalorder %v873_v24, 1  ;;  %vm1273_vm7 = vcmp.lt.s32.totalorder %v864_v14, 15 }
  0x94   :  { %vm1002_vm8 = vmand %vm1267_vm6, %vm971_vm5  ;;  %v121_v34 = vsel %vm1273_vm7, %v684_v13, %v685_v9 }
  0x95   :  { %624 = vmatpush1.bf16.msk.msra.mxu1 %vm623_vm11, %v622_v17  ;;  %v693_v19 = vpop.permute.xlu1 %692  ;;  %v688_v20 = vpop.permute.xlu0 %687  ;;  %vm1270_vm11 = vcmp.ge.s32.totalorder %v892_v32, 1  ;;  %vm1274_vm6 = vmmov %vm1273_vm7 }
  0x96   :  { %v695_v23 = vunpack.i.h.bf16 %v693_v19  ;;  %v694_v25 = vunpack.i.l.bf16 %v693_v19  ;;  %v690_v27 = vunpack.i.h.bf16 %v688_v20  ;;  %v689_v31 = vunpack.i.l.bf16 %v688_v20  ;;  %vm1011_vm14 = vmand %vm1270_vm11, %vm975_vm1 }
  0x97   :  { %v122_v35 = vsel %vm1274_vm6, %v680_v15, %v684_v13  ;;  %vm1275_vm9 = vmmov %vm1274_vm6  ;;  %vm1277_vm1 = vcmp.lt.s32.totalorder %v864_v14, 1 }
  0x98   :  { %v123_v36 = vsel %vm1275_vm9, %v679_v16, %v680_v15  ;;  %vm1276_vm5 = vmmov %vm1274_vm6  ;;  %v142_v38 = vsel %vm1277_vm1, %v694_v25, %v695_v23 }
  0x99   :  { %v124_v37 = vsel %vm1276_vm5, %v685_v9, %v679_v16  ;;  %vm626_vm11 = vmpackc.low %vm887_vm4, %vm992_vm13  ;;  %v625_v43 = vpack.c.bf16 %v142_v38, %v121_v34  ;;  %v703_v48 = vpop.permute.xlu1 %702  ;;  %v698_v49 = vpop.permute.xlu0 %697  ;;  %vm1292_vm5 = vcmp.le.s32.totalorder %v870_v22, 14 }
  0x9a   :  { %vm1278_vm3 = vmmov %vm1277_vm1  ;;  %v705_v50 = vunpack.i.h.bf16 %v703_v48  ;;  %v704_v51 = vunpack.i.l.bf16 %v703_v48  ;;  %v700_v52 = vunpack.i.h.bf16 %v698_v49  ;;  %v699_v54 = vunpack.i.l.bf16 %v698_v49 }
  0x9b   :  { %v143_v39 = vsel %vm1278_vm3, %v690_v27, %v694_v25  ;;  %vm1279_vm7 = vmmov %vm1277_vm1  ;;  %627 = vmatprep.subr.msk.bf16.mxu1 %vm626_vm11, %v625_v43 }
  0x9c   :  { %v144_v40 = vsel %vm1279_vm7, %v689_v31, %v690_v27  ;;  %vm1280_vm6 = vmmov %vm1277_vm1  ;;  %v628_v46 = vpack.c.bf16 %v143_v39, %v122_v35  ;;  %vm787_vm1 = vmmov 1  }
  0x9d   :  { %v145_v41 = vsel %vm1280_vm6, %v695_v23, %v689_v31  ;;  %v601_v44 = vpack.c.bf16 %v144_v40, %v123_v36  ;;  %vm1046_vm9 = vmpackc.low %vm929_vm15, %vm787_vm1  ;;  %vm1284_vm6 = vnez %v1257_v53  ;;  %vm1287_vm15 = vcmp.lt.s32.totalorder %v864_v14, 127  ;;  %v713_v28 = vpop.permute.xlu1 %712  ;;  %v708_v13 = vpop.permute.xlu0 %707 }
  0x9e   :  { %v604_v45 = vpack.c.bf16 %v145_v41, %v124_v37  ;;  %vm1283_vm7 = vmpackc.low %vm877_vm0, %vm961_vm10  ;;  %v159_v57 = vsel %vm1287_vm15, %v704_v51, %v705_v50 }
  0x9f   :  { %603 = vmatprep.subr.msk.bf16.mxu0 %vm1283_vm7, %v601_v44  ;;  %vm1063_vm3 = vmpackc.low %vm1284_vm6, %vm787_vm1  ;;  %v634_v62 = vpack.c.bf16 %v159_v57, %v846_v6  ;;  %v710_v6 = vunpack.i.h.bf16 %v708_v13 }
  0xa0   :  { %vm1288_vm10 = vmmov %vm1287_vm15 }
  0xa1   :  { %v160_v58 = vsel %vm1288_vm10, %v700_v52, %v704_v51  ;;  %vm1289_vm7 = vmmov %vm1288_vm10  ;;  %vm1297_vm10 = vnez %v1263_v12  ;;  %v723_v17 = vpop.permute.xlu1 %722  ;;  %v718_v18 = vpop.permute.xlu0 %717 }
  0xa2   :  { %v161_v59 = vsel %vm1289_vm7, %v699_v54, %v700_v52  ;;  %vm1290_vm13 = vmmov %vm1289_vm7  ;;  %v607_v63 = vpack.c.bf16 %v160_v58, %v841_v4  ;;  %v714_v4 = vunpack.i.l.bf16 %v713_v28  ;;  %v725_v30 = vunpack.i.h.bf16 %v723_v17 }
  0xa3   :  { %v162_v60 = vsel %vm1290_vm13, %v705_v50, %v699_v54  ;;  %vm1291_vm11 = vmpackc.low %vm882_vm2, %vm1002_vm8  ;;  %v610_v8 = vpack.c.bf16 %v161_v59, %v838_v3  ;;  %v715_v3 = vunpack.i.h.bf16 %v713_v28  ;;  %v724_v20 = vunpack.i.l.bf16 %v723_v17 }
  0xa4   :  { %606 = vmatpush1.bf16.msk.msra.mxu0 %vm1291_vm11, %v604_v45  ;;  %vm1085_vm15 = vmand %vm1292_vm5, %vm877_vm0  ;;  %v631_v9 = vpack.c.bf16 %v162_v60, %v849_v7  ;;  %vm1296_vm0 = vnez %v1261_v11  ;;  %v709_v7 = vunpack.i.l.bf16 %v708_v13  ;;  %vm1301_vm11 = vcmp.le.s32.totalorder %v875_v26, 14 }
  0xa5   :  { %vm1295_vm8 = vmpackc.low %vm918_vm12, %vm1011_vm14  ;;  %609 = vmatprep.subr.msk.bf16.mxu0 %vm1046_vm9, %v607_v63  ;;  %vm1298_vm14 = vcmp.le.s32.totalorder %v870_v22, 14  ;;  %vm1304_vm9 = vcmp.le.s32.totalorder %v873_v24, 14  ;;  %v720_v21 = vunpack.i.h.bf16 %v718_v18  ;;  %v719_v23 = vunpack.i.l.bf16 %v718_v18  ;;  %v208_v41 = vpop.permute.xlu1 %207  ;;  %v206_v43 = vpop.permute.xlu0 %205  ;;  %v384_v24 = vld [vmem:[%s1228_s4] sm:$0xff]  ;;  %s788_s4 = smov [#allocation5]  }
  0xa6   :  { %630 = vmatpush1.bf16.msk.msra.mxu1 %vm1295_vm8, %v628_v46  ;;  %vm611_vm5 = vmpackc.low %vm1296_vm0, %vm787_vm1  ;;  %387 = vperm.xlu1 %727, %v384_v24   ;;  %s550_s18 = sshll.u32 %s788_s4, 4  ;;  %s551_s18 = int_to_ptr.vmem [resolvable:$true] %s550_s18 }
  0xa7   :  { %vm635_vm7 = vmpackc.low %vm1297_vm10, %vm787_vm1  ;;  %633 = vmatprep.subr.msk.bf16.mxu1 %vm1063_vm3, %v631_v9  ;;  %vm175_vm1 = vcmp.lt.s32.totalorder %v864_v14, 113  ;;  %vm196_vm3 = vcmp.lt.s32.totalorder %v864_v14, 112  ;;  %p755_p9 = scmp.lt.s32.totalorder %s551_s18, %s551_s18 }
  0xa8   :  { %vm1114_vm8 = vmpackc.low %vm1298_vm14, %vm1085_vm15  ;;  %612 = vmatpush1.bf16.msk.msra.mxu0 %vm611_vm5, %v610_v8  ;;  %v176_v29 = vsel %vm175_vm1, %v714_v4, %v715_v3  ;;  %v177_v27 = vsel %vm175_vm1, %v710_v6, %v714_v4  ;;  %v178_v31 = vsel %vm175_vm1, %v709_v7, %v710_v6  ;;  %v179_v33 = vsel %vm175_vm1, %v715_v3, %v709_v7 }
  0xa9   :  { %vm1123_vm13 = vmand %vm1301_vm11, %vm887_vm4  ;;  %vm1307_vm4 = vcmp.le.s32.totalorder %v892_v32, 14  ;;  %v197_v42 = vsel %vm196_vm3, %v724_v20, %v725_v30  ;;  %v198_v34 = vsel %vm196_vm3, %v720_v21, %v724_v20  ;;  %v199_v35 = vsel %vm196_vm3, %v719_v23, %v720_v21 }
  0xaa   :  { %636 = vmatpush1.bf16.msk.msra.mxu1 %vm635_vm7, %v634_v62  ;;  %vm1132_vm15 = vmand %vm1304_vm9, %vm882_vm2  ;;  %v200_v36 = vsel %vm196_vm3, %v725_v30, %v719_v23  ;;  %v640_v37 = vpack.c.bf16 %v197_v42, %v176_v29  ;;  %v613_v38 = vpack.c.bf16 %v198_v34, %v177_v27  ;;  %v616_v39 = vpack.c.bf16 %v199_v35, %v178_v31 }
  0xab   :  { %vm1140_vm5 = vmand %vm1307_vm4, %vm918_vm12  ;;  %v637_v40 = vpack.c.bf16 %v200_v36, %v179_v33  ;;  %vm1313_vm1 = vnez %v1253_v47  ;;  %vm1314_vm3 = vcmp.le.s32.totalorder %v870_v22, 14  ;;  %v212_v22 = vpop.permute.xlu1 %211  ;;  %v210_v47 = vpop.permute.xlu0 %209 }
  0xac   :  { %vm1310_vm2 = vmmov %vm1301_vm11  ;;  %615 = vmatprep.subr.msk.bf16.mxu0 %vm1114_vm8, %v613_v38 }
  0xad   :  { %vm638_vm12 = vmpackc.low %vm1310_vm2, %vm1123_vm13 }
  0xae   :  { %vm1311_vm7 = vmmov %vm1304_vm9  ;;  %639 = vmatprep.subr.msk.bf16.mxu1 %vm638_vm12, %v637_v40 }
  0xaf   :  { %vm617_vm11 = vmpackc.low %vm1311_vm7, %vm1132_vm15 }
  0xb0   :  { %vm1312_vm13 = vmmov %vm1307_vm4  ;;  %618 = vmatpush1.bf16.msk.msra.mxu0 %vm617_vm11, %v616_v39 }
  0xb1   :  { %vm641_vm14 = vmpackc.low %vm1312_vm13, %vm1140_vm5 }
  0xb2   :  { %vm1176_vm9 = vmand %vm1314_vm3, %vm1313_vm1  ;;  %642 = vmatpush1.bf16.msk.msra.mxu1 %vm641_vm14, %v640_v37 }
  0xb3   :  { %vm1317_vm15 = vmmov %vm1310_vm2  ;;  %vm213_vm2 = vcmp.lt.s32.totalorder %v864_v14, 111  ;;  %v226_v14 = vld [vmem:[%s1225_s1] sm:$0xff] }
  0xb4   :  { %vm221_vm4 = vmand %vm1317_vm15, %vm1284_vm6  ;;  %v217_v53 = vsel %vm213_vm2, %v212_v22, %v206_v43  ;;  %v214_v45 = vsel %vm213_vm2, %v210_v47, %v212_v22  ;;  %v215_v26 = vsel %vm213_vm2, %v208_v41, %v210_v47  ;;  %vm234_vm6 = vcmask 588800  }
  0xb5   :  { %vm1318_vm5 = vmmov %vm1311_vm7  ;;  %v216_v46 = vsel %vm213_vm2, %v206_v43, %v208_v41  ;;  %573 = vmatprep.subr.msk.mxu0 %vm1176_vm9, %v215_v26  ;;  %590 = vmatprep.subr.msk.mxu1 %vm221_vm4, %v217_v53 }
  0xb6   :  { %vm218_vm7 = vmand %vm1318_vm5, %vm1296_vm0  ;;  %vm390_vm0 = vcmask 64512  }
  0xb7   :  { %vm1319_vm8 = vmmov %vm1312_vm13  ;;  %574 = vmatpush1.msk.msra.mxu0 %vm218_vm7, %v216_v46 }
  0xb8   :  { %vm220_vm12 = vmand %vm1319_vm8, %vm1297_vm10  ;;  %575 = vmatmul.mubr.msk.f32.vlgmr.msra.gmra.mrb[0].mxu0 %vm234_vm6, %v226_v14 }
  0xb9   :  { %591 = vmatpush1.msk.msra.mxu1 %vm220_vm12, %v214_v45  ;;  %458 = vmatprep.mubr.f32.mxu0 %v783_v10 }
  0xba   :  { %592 = vmatmul.mubr.msk.f32.vlgmr.msra.gmra.mrb[0].mxu1 %vm234_vm6, %v226_v14  ;;  %v232_v32 = vpop.permute.xlu0 %231 }
  0xbb   :  { %529 = vmatprep.mubr.f32.mxu1 %v783_v10  ;;  %v227_v10 = vld [vmem:[%s1227_s3] sm:$0xff]  ;;  %s750_s3 = scalar_lea.vmem %s551_s18, 512 }
  0xbc   :  { %p751_p8 = scmp.ne.s32.totalorder %s551_s18, %s750_s3  ;;  %p756_p10 = scmp.lt.s32.totalorder %s750_s3, %s750_s3 }
  0xbe   :  { %p757_p11 = por %p756_p10, %p755_p9 }
  0xc0   :  { %p758_p12 = pnand %p757_p11, %p751_p8 }
 0x125   :  { %v388_v59 = vpop.permute.xlu1 %387 }
 0x18b   :  { %v304_v11 = vpop.f32.mrb[0].mxu0 }
 0x18c   :  { %v305_v48 = vadd.f32 %v304_v11, %v232_v32  ;;  %v306_v50 = vpop.f32.mrb[1].mxu0 }
 0x18d   :  { %v375_v12 = vpop.f32.mrb[0].mxu1  ;;  %v307_v52 = vadd.f32 %v306_v50, %v232_v32 }
 0x18e   :  { %v376_v49 = vadd.f32 %v375_v12, %v232_v32  ;;  %v377_v51 = vpop.f32.mrb[1].mxu1  ;;  %v380_v57 = vmax.f32 %v305_v48, 0.0 }
 0x18f   :  { %v378_v54 = vadd.f32 %v377_v51, %v232_v32  ;;  %v381_v55 = vmax.f32 %v307_v52, 0.0 }
 0x190   :  { %v382_v58 = vmax.f32 %v376_v49, 0.0 }
 0x191   :  { %v383_v56 = vmax.f32 %v378_v54, 0.0  ;;  %394 = vmatprep.subr.mxu0 %v381_v55 }
 0x192   :  { %395 = vmatpush1.msra.mxu0 %v380_v57 }
 0x193   :  { %465 = vmatprep.subr.mxu1 %v383_v56  ;;  %593 = vmatmul.mubr.msk.f32.vlgmr.msra.gmra.mrb[2].mxu0 %vm390_vm0, %v227_v10 }
 0x194   :  { %466 = vmatpush1.msra.mxu1 %v382_v58 }
 0x195   :  { %594 = vmatmul.mubr.msk.f32.vlgmr.msra.gmra.mrb[2].mxu1 %vm390_vm0, %v227_v10 }
 0x266   :  { %v460_v60 = vpop.f32.mrb[2].mxu0 }
 0x267   :  { %v461_v62 = vadd.f32 %v460_v60, %v388_v59  ;;  %v462_v8 = vpop.f32.mrb[3].mxu0 }
 0x268   :  { %v531_v61 = vpop.f32.mrb[2].mxu1  ;;  %v463_v28 = vadd.f32 %v462_v8, %v388_v59 }
 0x269   :  { %v532_v63 = vadd.f32 %v531_v61, %v388_v59  ;;  %v533_v9 = vpop.f32.mrb[3].mxu1  ;;  %v536_v3 = vadd.f32 %v461_v62, %v831_v0 }
 0x26a   :  { %v534_v13 = vadd.f32 %v533_v9, %v388_v59  ;;  %v537_v6 = vadd.f32 %v463_v28, %v833_v1 }
 0x26b   :  { %v538_v4 = vadd.f32 %v532_v63, %v835_v2  ;;  %540 = vst [vmem:[#allocation5] sm:$0xff] %v536_v3 }
 0x26c   :  { %v539_v7 = vadd.f32 %v534_v13, %v843_v5  ;;  %541 = vst [vmem:[#allocation5 + $0x8] sm:$0xff] %v537_v6 }
 0x26d   :  { %542 = vst [vmem:[#allocation5 + $0x10] sm:$0xff] %v538_v4 }
 0x26e   :  { %543 = vst [vmem:[#allocation5 + $0x18] sm:$0xff] %v539_v7 }
 0x26f   :  { %761 = shalt.err (!%p758_p12)
}
 0x270   :  { %s762_s21 = scalar_lea.hbm %s1229_s5, 512 }
 0x271   :  { %p763_p13 = scmp.ne.s32.totalorder %s1229_s5, %s762_s21  ;;  %p766_p0 = scmp.lt.u32.totalorder %s762_s21, %s1229_s5 }
 0x273   :  { %p768_p1 = pnand %p766_p0, %p763_p13 }
 0x275   :  { %771 = shalt.err (!%p768_p1)
}
 0x276   :  { %553 = dma.vmem_to_hbm [thread:$0]  %s551_s18, 512, %s1229_s5, [#allocation4]  }
 0x277   :  { %774 = dma.done.wait [#allocation4], 512  }
 0x278   :  { %775 = vsyncadd [#allocation4], 4294966784 }
 0x279   :  { %557 = vsyncpa [#allocation3], 1 }
 0x27a   :  { %558 = vsyncpa [#allocation4], 1 }

</bundles_post_ra>
